<compile_context>
chip_gen: v6e
topology: v6e:2x2x1
jax: 0.10.0
libtpu: 0.0.40
codegen_flags: <defaults>
</compile_context>

<pallas_src>
import jax
import jax.numpy as jnp
from jax.experimental import pallas as pl
from jax.experimental.pallas import tpu as pltpu

EPS = 1e-5          # nn.BatchNorm1d default eps
NEG_SLOPE = 0.01    # nn.LeakyReLU default negative_slope
CIN_PAD = 8         # pad the 3 input channels up to 8 zero channels (MXU-friendly)
TN_TARGET = 256     # Cout tile target (256-aligned for the 2x256x256 MXU on v6e/v7x)
VMEM_LIMIT = 48 * 1024 * 1024   # fits under v7x's 64 MiB physical VMEM

_VMEM = pl.BlockSpec(memory_space=pltpu.MemorySpace.VMEM)


def _pick_tn(cout):
    """Largest 128-multiple tile <= TN_TARGET that divides Cout (or full Cout)."""
    if cout <= TN_TARGET:
        return cout
    t = TN_TARGET
    while t >= 128:
        if cout % t == 0:
            return t
        t -= 128
    return cout


# ---------------------------------------------------------------------------
# Pass 1: conv (K shifted matmuls, bf16 in / f32 acc) + partial BN statistics
# ---------------------------------------------------------------------------
def _make_conv_kernel(K, stride):
    def kernel(x_ref, w_ref, y_ref, stats_ref):
        # x_ref: (stride, 1, L_phase, Cin) bf16 ; w_ref: (K, Cin, tn) bf16
        # y_ref: (1, L_out, tn) f32 ; stats_ref: (1, 2, tn) f32
        L_out = y_ref.shape[1]
        tn = w_ref.shape[2]
        phases = [x_ref[q, 0, :, :] for q in range(stride)]   # each (L_phase, Cin)
        acc = jnp.zeros((L_out, tn), jnp.float32)
        for t in range(K):                                     # unrolled taps
            q, d = t % stride, t // stride
            xs = phases[q][d:d + L_out]                        # static shifted slice
            acc = acc + jnp.dot(xs, w_ref[t],
                                preferred_element_type=jnp.float32)
        y_ref[0, :, :] = acc
        s1 = jnp.sum(acc, axis=0, keepdims=True)               # (1, tn)
        s2 = jnp.sum(acc * acc, axis=0, keepdims=True)         # (1, tn)
        stats_ref[0, :, :] = jnp.concatenate([s1, s2], axis=0)
    return kernel


# ---------------------------------------------------------------------------
# Pass 2: y*scale + shift (+ residual) + LeakyReLU  (all f32 math, bf16 out)
# ---------------------------------------------------------------------------
def _make_bn_act_kernel(has_res, use_act):
    def kernel(y_ref, sc_ref, sh_ref, *rest):
        if has_res:
            res_ref, o_ref = rest
        else:
            (o_ref,) = rest
        y = y_ref[...] * sc_ref[...] + sh_ref[...]
        if has_res:
            y = y + res_ref[...].astype(jnp.float32)
        if use_act:
            y = jnp.where(y >= 0, y, NEG_SLOPE * y)            # LeakyReLU(0.01)
        o_ref[...] = y.astype(o_ref.dtype)
    return kernel


def conv_bn(x, w, gamma, beta, *, stride, pad, res=None, use_act=True):
    """x: (B, L, Cin) bf16 ; w: (K, Cin, Cout) bf16.  Returns (B, L_out, Cout) bf16."""
    B, L, Cin = x.shape
    K, Cin_w, Cout = w.shape
    assert Cin == Cin_w
    L_out = (L + 2 * pad - K) // stride + 1

    # Stride-phase decomposition: the kernel reads the activation exactly once and
    # performs the K taps as contiguous shifted slices (no K-fold im2col in HBM).
    if K == 1:
        phases = x[:, ::stride, :][:, :L_out][None]            # (1, B, L_out, Cin)
        s_eff, L_phase = 1, L_out
    else:
        xp = jnp.pad(x, ((0, 0), (pad, pad), (0, 0))) if pad else x
        s_eff = stride
        L_phase = max(t // s_eff for t in range(K)) + L_out
        plist = []
        for q in range(s_eff):
            ph = xp[:, q::s_eff, :]
            if ph.shape[1] < L_phase:
                ph = jnp.pad(ph, ((0, 0), (0, L_phase - ph.shape[1]), (0, 0)))
            plist.append(ph[:, :L_phase, :])
        phases = jnp.stack(plist, axis=0)                      # (s, B, L_phase, Cin)

    tn = _pick_tn(Cout)
    n_j = Cout // tn
    flops = 2 * B * L_out * Cout * K * Cin
    bytes_acc = int((phases.size + w.size) * 2 + (B * L_out * Cout + B * 2 * Cout) * 4)

    y, stats = pl.pallas_call(
        _make_conv_kernel(K, s_eff),
        grid=(B, n_j),
        in_specs=[
            pl.BlockSpec((s_eff, 1, L_phase, Cin), lambda b, j: (0, b, 0, 0)),
            pl.BlockSpec((K, Cin, tn), lambda b, j: (0, 0, j)),
        ],
        out_specs=(
            pl.BlockSpec((1, L_out, tn), lambda b, j: (b, 0, j)),
            pl.BlockSpec((1, 2, tn), lambda b, j: (b, 0, j)),
        ),
        out_shape=(
            jax.ShapeDtypeStruct((B, L_out, Cout), jnp.float32),
            jax.ShapeDtypeStruct((B, 2, Cout), jnp.float32),
        ),
        compiler_params=pltpu.CompilerParams(
            dimension_semantics=("parallel", "parallel"),
            vmem_limit_bytes=VMEM_LIMIT),
        cost_estimate=pl.CostEstimate(
            flops=flops, transcendentals=0, bytes_accessed=bytes_acc),
    )(phases, w)

    # Global training-mode BN statistics (biased variance) from the partials.
    tot = jnp.sum(stats, axis=0)                               # (2, Cout) f32
    cnt = float(B * L_out)
    mean = tot[0] / cnt
    var = jnp.maximum(tot[1] / cnt - mean * mean, 0.0)
    scale = gamma * jax.lax.rsqrt(var + EPS)
    shift = beta - mean * scale

    inputs = [y, scale.reshape(1, 1, Cout), shift.reshape(1, 1, Cout)]
    in_specs = [
        pl.BlockSpec((1, L_out, tn), lambda b, j: (b, 0, j)),
        pl.BlockSpec((1, 1, tn), lambda b, j: (0, 0, j)),
        pl.BlockSpec((1, 1, tn), lambda b, j: (0, 0, j)),
    ]
    if res is not None:
        inputs.append(res)
        in_specs.append(pl.BlockSpec((1, L_out, tn), lambda b, j: (b, 0, j)))

    out = pl.pallas_call(
        _make_bn_act_kernel(res is not None, use_act),
        grid=(B, n_j),
        in_specs=in_specs,
        out_specs=pl.BlockSpec((1, L_out, tn), lambda b, j: (b, 0, j)),
        out_shape=jax.ShapeDtypeStruct((B, L_out, Cout), jnp.bfloat16),
        compiler_params=pltpu.CompilerParams(
            dimension_semantics=("parallel", "parallel"),
            vmem_limit_bytes=VMEM_LIMIT),
    )(*inputs)
    return out


# ---------------------------------------------------------------------------
# MaxPool1d(kernel=3, stride=2, padding=1) — one-pass kernel over phase-split input
# ---------------------------------------------------------------------------
def _maxpool_kernel(e_ref, o_ref, out_ref):
    L_out = out_ref.shape[1]
    a = e_ref[0, 0:L_out, :]
    b = o_ref[0, 0:L_out, :]
    c = e_ref[0, 1:L_out + 1, :]
    out_ref[0, :, :] = jnp.maximum(jnp.maximum(a, b), c)


def maxpool1d_k3_s2_p1(x):
    B, L, C = x.shape
    L_out = (L + 2 - 3) // 2 + 1
    xp = jnp.pad(x, ((0, 0), (1, 1), (0, 0)), constant_values=-jnp.inf)
    Lph = L_out + 1

    def phase(q):
        ph = xp[:, q::2, :]
        if ph.shape[1] < Lph:
            ph = jnp.pad(ph, ((0, 0), (0, Lph - ph.shape[1]), (0, 0)),
                         constant_values=-jnp.inf)
        return ph[:, :Lph, :]

    e, o = phase(0), phase(1)
    return pl.pallas_call(
        _maxpool_kernel,
        grid=(B,),
        in_specs=[pl.BlockSpec((1, Lph, C), lambda b: (b, 0, 0)),
                  pl.BlockSpec((1, Lph, C), lambda b: (b, 0, 0))],
        out_specs=pl.BlockSpec((1, L_out, C), lambda b: (b, 0, 0)),
        out_shape=jax.ShapeDtypeStruct((B, L_out, C), x.dtype),
        compiler_params=pltpu.CompilerParams(
            dimension_semantics=("parallel",), vmem_limit_bytes=VMEM_LIMIT),
    )(e, o)


# ---------------------------------------------------------------------------
# AdaptiveAvgPool1d(1) — mean over the length axis, one grid step per batch element
# ---------------------------------------------------------------------------
def _avgpool_kernel(x_ref, o_ref):
    o_ref[...] = jnp.mean(x_ref[...].astype(jnp.float32), axis=1, keepdims=True)


def adaptive_avgpool1(x):
    B, L, C = x.shape
    out = pl.pallas_call(
        _avgpool_kernel,
        grid=(B,),
        in_specs=[pl.BlockSpec((1, L, C), lambda b: (b, 0, 0))],
        out_specs=pl.BlockSpec((1, 1, C), lambda b: (b, 0, 0)),
        out_shape=jax.ShapeDtypeStruct((B, 1, C), jnp.float32),
        compiler_params=pltpu.CompilerParams(
            dimension_semantics=("parallel",), vmem_limit_bytes=VMEM_LIMIT),
    )(x)
    return out.reshape(B, C)


# ---------------------------------------------------------------------------
# Fully-connected layer (tiny: single VMEM-resident matmul + bias)
# ---------------------------------------------------------------------------
def _fc_kernel(x_ref, w_ref, b_ref, o_ref):
    o_ref[...] = (jnp.dot(x_ref[...], w_ref[...],
                          preferred_element_type=jnp.float32) + b_ref[...])


def fc_layer(x, w, b):
    B = x.shape[0]
    n_cls = w.shape[1]
    return pl.pallas_call(
        _fc_kernel,
        out_shape=jax.ShapeDtypeStruct((B, n_cls), jnp.float32),
        in_specs=[_VMEM, _VMEM, _VMEM],
        out_specs=_VMEM,
    )(x, w, b.reshape(1, n_cls))


# ---------------------------------------------------------------------------
# BasicBlock (expansion = 1)
# ---------------------------------------------------------------------------
def basic_block(x, p):
    stride = p["stride"]
    identity = x
    out = conv_bn(x, p["conv1_w"], p["bn1_g"], p["bn1_b"],
                  stride=stride, pad=1, use_act=True)
    if "ds_w" in p:   # downsample = Conv1d(k=1, stride) + BN, no activation
        identity = conv_bn(x, p["ds_w"], p["ds_g"], p["ds_b"],
                           stride=stride, pad=0, use_act=False)
    # conv2 -> bn2 -> (+identity) -> LeakyReLU (residual fused in the bn pass)
    out = conv_bn(out, p["conv2_w"], p["bn2_g"], p["bn2_b"],
                  stride=1, pad=1, res=identity, use_act=True)
    return out


# ---------------------------------------------------------------------------
# Parameter init (deterministic, synthetic; weights stored in matmul layout, bf16)
# ---------------------------------------------------------------------------
def init_params(key, layers, num_classes=336):
    keys = iter(jax.random.split(key, 4 * sum(layers) + 8))

    def conv_w(k, cin, cout):
        w = 0.05 * jax.random.normal(next(keys), (k, cin, cout), jnp.float32)
        return w.astype(jnp.bfloat16)        # (K, Cin, Cout) matmul layout

    # conv1d(3 -> 64, k=3): Cin padded from 3 to CIN_PAD with zero rows
    w1 = 0.05 * jax.random.normal(next(keys), (3, 3, 64), jnp.float32)
    w1 = jnp.pad(w1, ((0, 0), (0, CIN_PAD - 3), (0, 0))).astype(jnp.bfloat16)
    params = {
        "conv1_w": w1,
        "bn1_g": jnp.ones((64,), jnp.float32),
        "bn1_b": jnp.zeros((64,), jnp.float32),
    }
    in_ch = 64
    blocks = []
    for si, (out_ch, n) in enumerate(zip([64, 128, 256, 512], layers)):
        for bi in range(n):
            stride = 2 if (si > 0 and bi == 0) else 1
            p = {
                "stride": stride,
                "conv1_w": conv_w(3, in_ch, out_ch),
                "bn1_g": jnp.ones((out_ch,), jnp.float32),
                "bn1_b": jnp.zeros((out_ch,), jnp.float32),
                "conv2_w": conv_w(3, out_ch, out_ch),
                "bn2_g": jnp.ones((out_ch,), jnp.float32),
                "bn2_b": jnp.zeros((out_ch,), jnp.float32),
            }
            if stride != 1 or in_ch != out_ch:
                p["ds_w"] = conv_w(1, in_ch, out_ch)
                p["ds_g"] = jnp.ones((out_ch,), jnp.float32)
                p["ds_b"] = jnp.zeros((out_ch,), jnp.float32)
            blocks.append(p)
            in_ch = out_ch
    params["blocks"] = blocks
    params["fc_w"] = 0.05 * jax.random.normal(next(keys), (in_ch, num_classes), jnp.float32)
    params["fc_b"] = 0.05 * jax.random.normal(next(keys), (num_classes,), jnp.float32)
    return params


# ---------------------------------------------------------------------------
# Full forward
# ---------------------------------------------------------------------------
def resnet_forward(params, x):
    # x: (B, seq_len, 3) float32.  Zero-pad channels 3->8 (weights for the padded
    # channels are zero, so math is identical to Conv1d(3, 64)).
    B, L, cin = x.shape
    x = jnp.pad(x, ((0, 0), (0, 0), (0, CIN_PAD - cin))).astype(jnp.bfloat16)
    x = conv_bn(x, params["conv1_w"], params["bn1_g"], params["bn1_b"],
                stride=2, pad=1, use_act=True)            # conv1 + bn1 + LeakyReLU
    x = maxpool1d_k3_s2_p1(x)                             # maxpool
    for p in params["blocks"]:                            # layer1..layer4
        x = basic_block(x, p)
    x = adaptive_avgpool1(x)                              # (B, 512) f32
    return fc_layer(x, params["fc_w"], params["fc_b"])    # (B, num_classes)


if __name__ == "__main__":
    key = jax.random.PRNGKey(0)
    kx, kp = jax.random.split(key)
    B, L, C_IN = 2, 64, 3
    x = jax.random.normal(kx, (B, L, C_IN), jnp.float32)
    # small network: block=BasicBlock, layers=[1,1,1,1], num_classes=336 (module default)
    params = init_params(kp, layers=[1, 1, 1, 1], num_classes=336)
    out = resnet_forward(params, x)
    out = jax.block_until_ready(out)
    assert out.shape == (B, 336) and out.dtype == jnp.float32
    print("KERNEL_OK")
</pallas_src>

<mosaic_0001>
module attributes {stable_mosaic.version = 11 : i64} {
  func.func @kernel(%arg0: i32, %arg1: i32, %arg2: memref<2x1x33x8xbf16, #tpu.memory_space<vmem>>, %arg3: memref<3x8x64xbf16, #tpu.memory_space<vmem>>, %arg4: memref<1x32x64xf32, #tpu.memory_space<vmem>>, %arg5: memref<1x2x64xf32, #tpu.memory_space<vmem>>) attributes {dimension_semantics = [#tpu.dimension_semantics<parallel>, #tpu.dimension_semantics<parallel>], iteration_bounds = array<i64: 2, 1>, scalar_prefetch = 0 : i64, scratch_operands = 0 : i64, tpu.core_type = #tpu.core_type<tc>, window_params = [{transform_indices = @transform_0, window_bounds = array<i64: 2, 1, 33, 8>}, {transform_indices = @transform_1, window_bounds = array<i64: 3, 8, 64>}, {transform_indices = @transform_2, window_bounds = array<i64: 1, 32, 64>}, {transform_indices = @transform_3, window_bounds = array<i64: 1, 2, 64>}]} {
    %c0 = arith.constant 0 : index
    %c0_0 = arith.constant 0 : index
    %c0_1 = arith.constant 0 : index
    %c0_2 = arith.constant 0 : index
    %0 = vector.load %arg2[%c0, %c0_0, %c0_1, %c0_2] : memref<2x1x33x8xbf16, #tpu.memory_space<vmem>>, vector<1x1x33x8xbf16>
    %1 = vector.shape_cast %0 : vector<1x1x33x8xbf16> to vector<33x8xbf16>
    %c1 = arith.constant 1 : index
    %c0_3 = arith.constant 0 : index
    %c0_4 = arith.constant 0 : index
    %c0_5 = arith.constant 0 : index
    %2 = vector.load %arg2[%c1, %c0_3, %c0_4, %c0_5] : memref<2x1x33x8xbf16, #tpu.memory_space<vmem>>, vector<1x1x33x8xbf16>
    %3 = vector.shape_cast %2 : vector<1x1x33x8xbf16> to vector<33x8xbf16>
    %cst = arith.constant 0.000000e+00 : f32
    %4 = vector.broadcast %cst : f32 to vector<32x64xf32>
    %5 = vector.extract_strided_slice %1 {offsets = [0, 0], sizes = [32, 8], strides = [1, 1]} : vector<33x8xbf16> to vector<32x8xbf16>
    %c0_6 = arith.constant 0 : index
    %c0_7 = arith.constant 0 : index
    %c0_8 = arith.constant 0 : index
    %6 = vector.load %arg3[%c0_6, %c0_7, %c0_8] : memref<3x8x64xbf16, #tpu.memory_space<vmem>>, vector<1x8x64xbf16>
    %7 = vector.shape_cast %6 : vector<1x8x64xbf16> to vector<8x64xbf16>
    %cst_9 = arith.constant dense<0.000000e+00> : vector<32x64xf32>
    %8 = tpu.matmul %5, %7, %cst_9 {dimension_numbers = #tpu.dot_dimension_numbers<[1], [0], [0], [1], [0, 0, 1, 1], [], []>} : vector<32x8xbf16>, vector<8x64xbf16>, vector<32x64xf32> -> vector<32x64xf32>
    %9 = arith.addf %4, %8 : vector<32x64xf32>
    %10 = vector.extract_strided_slice %3 {offsets = [0, 0], sizes = [32, 8], strides = [1, 1]} : vector<33x8xbf16> to vector<32x8xbf16>
    %c1_10 = arith.constant 1 : index
    %c0_11 = arith.constant 0 : index
    %c0_12 = arith.constant 0 : index
    %11 = vector.load %arg3[%c1_10, %c0_11, %c0_12] : memref<3x8x64xbf16, #tpu.memory_space<vmem>>, vector<1x8x64xbf16>
    %12 = vector.shape_cast %11 : vector<1x8x64xbf16> to vector<8x64xbf16>
    %cst_13 = arith.constant dense<0.000000e+00> : vector<32x64xf32>
    %13 = tpu.matmul %10, %12, %cst_13 {dimension_numbers = #tpu.dot_dimension_numbers<[1], [0], [0], [1], [0, 0, 1, 1], [], []>} : vector<32x8xbf16>, vector<8x64xbf16>, vector<32x64xf32> -> vector<32x64xf32>
    %14 = arith.addf %9, %13 : vector<32x64xf32>
    %15 = vector.extract_strided_slice %1 {offsets = [1, 0], sizes = [32, 8], strides = [1, 1]} : vector<33x8xbf16> to vector<32x8xbf16>
    %c2 = arith.constant 2 : index
    %c0_14 = arith.constant 0 : index
    %c0_15 = arith.constant 0 : index
    %16 = vector.load %arg3[%c2, %c0_14, %c0_15] : memref<3x8x64xbf16, #tpu.memory_space<vmem>>, vector<1x8x64xbf16>
    %17 = vector.shape_cast %16 : vector<1x8x64xbf16> to vector<8x64xbf16>
    %cst_16 = arith.constant dense<0.000000e+00> : vector<32x64xf32>
    %18 = tpu.matmul %15, %17, %cst_16 {dimension_numbers = #tpu.dot_dimension_numbers<[1], [0], [0], [1], [0, 0, 1, 1], [], []>} : vector<32x8xbf16>, vector<8x64xbf16>, vector<32x64xf32> -> vector<32x64xf32>
    %19 = arith.addf %14, %18 : vector<32x64xf32>
    %c0_17 = arith.constant 0 : index
    %c0_18 = arith.constant 0 : index
    %c0_19 = arith.constant 0 : index
    %20 = vector.load %arg4[%c0_17, %c0_18, %c0_19] : memref<1x32x64xf32, #tpu.memory_space<vmem>>, vector<1x32x64xf32>
    %21 = vector.shape_cast %20 : vector<1x32x64xf32> to vector<32x64xf32>
    %22 = vector.shape_cast %19 : vector<32x64xf32> to vector<1x32x64xf32>
    tpu.vector_store %arg4[%c0_17, %c0_18, %c0_19], %22 {strides = array<i32>} : memref<1x32x64xf32, #tpu.memory_space<vmem>>, vector<1x32x64xf32>,
    %cst_20 = arith.constant dense<0.000000e+00> : vector<64xf32>
    %23 = vector.multi_reduction <add>, %19, %cst_20 [0] : vector<32x64xf32> to vector<64xf32>
    %24 = vector.shape_cast %23 : vector<64xf32> to vector<1x64xf32>
    %25 = arith.mulf %19, %19 : vector<32x64xf32>
    %cst_21 = arith.constant dense<0.000000e+00> : vector<64xf32>
    %26 = vector.multi_reduction <add>, %25, %cst_21 [0] : vector<32x64xf32> to vector<64xf32>
    %27 = vector.shape_cast %26 : vector<64xf32> to vector<1x64xf32>
    %28 = tpu.concatenate %24, %27 in 0 : vector<1x64xf32>, vector<1x64xf32> -> vector<2x64xf32>
    %c0_22 = arith.constant 0 : index
    %c0_23 = arith.constant 0 : index
    %c0_24 = arith.constant 0 : index
    %29 = vector.load %arg5[%c0_22, %c0_23, %c0_24] : memref<1x2x64xf32, #tpu.memory_space<vmem>>, vector<1x2x64xf32>
    %30 = vector.shape_cast %29 : vector<1x2x64xf32> to vector<2x64xf32>
    %31 = vector.shape_cast %28 : vector<2x64xf32> to vector<1x2x64xf32>
    tpu.vector_store %arg5[%c0_22, %c0_23, %c0_24], %31 {strides = array<i32>} : memref<1x2x64xf32, #tpu.memory_space<vmem>>, vector<1x2x64xf32>,
    return
  }
  func.func @transform_0(%arg0: i32, %arg1: i32) -> (i32, i32, i32, i32) {
    %c0_i32 = arith.constant 0 : i32
    %c0_i32_0 = arith.constant 0 : i32
    %c0_i32_1 = arith.constant 0 : i32
    %c0_i32_2 = arith.constant 0 : i32
    return %c0_i32, %arg0, %c0_i32_0, %c0_i32_1 : i32, i32, i32, i32
  }
  func.func @transform_1(%arg0: i32, %arg1: i32) -> (i32, i32, i32) {
    %c0_i32 = arith.constant 0 : i32
    %c0_i32_0 = arith.constant 0 : i32
    %c0_i32_1 = arith.constant 0 : i32
    return %c0_i32, %c0_i32_0, %arg1 : i32, i32, i32
  }
  func.func @transform_2(%arg0: i32, %arg1: i32) -> (i32, i32, i32) {
    %c0_i32 = arith.constant 0 : i32
    %c0_i32_0 = arith.constant 0 : i32
    return %arg0, %c0_i32, %arg1 : i32, i32, i32
  }
  func.func @transform_3(%arg0: i32, %arg1: i32) -> (i32, i32, i32) {
    %c0_i32 = arith.constant 0 : i32
    %c0_i32_0 = arith.constant 0 : i32
    return %arg0, %c0_i32, %arg1 : i32, i32, i32
  }
}

</mosaic_0001>

<bundles_post_ra>
// kernel: tpu_custom_call.1
= control target key start
LH: loop header
LB: loop body
LE: loop exit
PB: predicated region body
PF: predicated region fallthrough
CT: control target
= control target key end

     0   :  { %9 = vsyncpa [#allocation4], 0  ;;  %s1176_s0 = inlined_call_operand.vmem [shape: bf16[2,2,33,8], index: 0, kind: input, shape index: {}]   ;;  %s1177_s1 = inlined_call_operand.vmem [shape: bf16[3,8,64], index: 1, kind: input, shape index: {}]   ;;  %s1178_s2 = inlined_call_operand.hbm [shape: f32[2,32,64], index: 2, kind: output, shape index: {0}]   ;;  %s1179_s3 = inlined_call_operand.hbm [shape: f32[2,2,64], index: 3, kind: output, shape index: {1}]  }
   0x1   :  { %11 = vsyncpa [#allocation4 + $0x1], 0 }
   0x2   :  { %12 = vsyncpa [#allocation6], 0 }
   0x3   :  { %14 = vsyncpa [#allocation6 + $0x1], 0  ;;  %s996_s12 = smov 0   ;;  %s998_s13 = smov 0  }
   0x4   :  { %s1000_s14 = smov 0   ;;  %s1002_s15 = smov 0  }
   0x5   :  { %s1004_s16 = smov 0   ;;  %s1006_s17 = smov 0  }
   0x6 LB: > { %s730_s18 = sadd.s32 4294967295, %s970_s17   ;;  %s731_s19 = sadd.s32 4294967294, %s970_s17   ;;  %s970_s17 = sphi %s1006_s17, %s20_s17   ;;  %s966_s16 = sphi %s1004_s16, %s1186_s16   ;;  %s962_s15 = sphi %s1002_s15, %s1185_s15   ;;  %s958_s14 = sphi %s1000_s14, %s1184_s14   ;;  %s954_s13 = sphi %s998_s13, %s1183_s13   ;;  %s950_s12 = sphi %s996_s12, %s1182_s12  }
   0x7   : > { %s32_s20 = sadd.s32 1, %s966_s16  ;;  %s39_s21 = sadd.s32 1, %s958_s14 }
   0x8   : > { %p34_p0 = scmp.ge.s32.totalorder %s32_s20, 2  ;;  %p46_p1 = scmp.ne.s32.totalorder %s958_s14, %s954_s13 }
   0x9   : > { %p47_p2 = scmp.eq.s32.totalorder %s970_s17, 0  ;;  %p104_p3 = scmp.eq.s32.totalorder %s730_s18, 1 }
   0xa   : > { %s1188_s20 = smov (%p34_p0, %s32_s20), 0  ;;  %p109_p6 = scmp.ne.s32.totalorder %s954_s13, %s950_s12 }
   0xb   : > { %p48_p4 = por %p47_p2, %p46_p1  ;;  %p1035_p5 = por %p104_p3, %p46_p1 }
   0xc   : > { %s36_s23 = ssub.s32 %s966_s16, %s1188_s20  ;;  %p110_p8 = scmp.eq.s32.totalorder %s731_s19, 1 }
   0xd   : > { %p37_p7 = scmp.eq.s32.totalorder %s36_s23, 0  ;;  %p734_p10 = scmp.ge.s32.totalorder %s970_s17, 2 }
   0xe   : > { %p1046_p9 = por %p110_p8, %p109_p6 }
   0xf   : > { %s1044_s24 = scalar_select %p37_p7, %s958_s14, %s39_s21  }
  0x10   : > { %161 = sbr.rel (%p734_p10) target bundleno = 29 (0x1d), region = 20 }
  0x15   : > { %164 = sbr.rel (!%p48_p4) target bundleno = 29 (0x1d), region = 24  ;;  %s166_s26 = sand.u32 (%p48_p4), 1, %s958_s14  }
  0x16   : > { %s795_s27 = smul.u32 (%p48_p4), 20, %s966_s16 }
  0x17   : > { %s794_s28 = smul.u32 (%p48_p4), 40, %s166_s26 }
  0x18   : > { %s171_s4 = scalar_lea.vmem (%p48_p4), %s1176_s0, %s795_s27 }
  0x19   : > { %v188_v0 = vld [vmem:[%s171_s4] sm:$0xff] (%p48_p4)   ;;  %v192_v1 = vld [vmem:[%s171_s4 + $0x8] sm:$0xff] (%p48_p4)   ;;  %v196_v2 = vld [vmem:[%s171_s4 + $0x10] sm:$0xf] (%p48_p4)  ;;  %s168_s5 = scalar_lea.vmem (%p48_p4), [#allocation2], %s794_s28 }
  0x1a   : > { %189 = vst [vmem:[%s168_s5] sm:$0xff] %v188_v0   ;;  %193 = vst [vmem:[%s168_s5 + $0x8] sm:$0xff] %v192_v1   ;;  %v198_v3 = vld [vmem:[%s171_s4 + $0x28] sm:$0xff]   ;;  %v202_v4 = vld [vmem:[%s171_s4 + $0x30] sm:$0xff]  }
  0x1b   : > { %197 = vst [vmem:[%s168_s5 + $0x10] sm:$0xf] %v196_v2  ;;  %v206_v5 = vld [vmem:[%s171_s4 + $0x38] sm:$0xf]  ;;  %199 = vst [vmem:[%s168_s5 + $0x14] sm:$0xff] %v198_v3  }
  0x1c   : > { %203 = vst [vmem:[%s168_s5 + $0x1c] sm:$0xff] %v202_v4   ;;  %207 = vst [vmem:[%s168_s5 + $0x24] sm:$0xf] %v206_v5 }
  0x1d PF: > { %p736_p11 = scmp.ge.s32.totalorder %s970_s17, 1  ;;  %p250_p12 = scmp.lt.s32.totalorder %s970_s17, 3 }
  0x1f   : > { %p251_p13 = pnand %p736_p11, %p250_p12 }
  0x20   : > { %s1067_s10 = sand.u32 (!%p251_p13), 1, %s954_s13   ;;  %s763_s28 = sshll.u32 (!%p251_p13), %s962_s15, 9 }
  0x21   : > { %254 = sbr.rel (%p251_p13) target bundleno = 298 (0x12a), region = 65  ;;  %s737_s23 = sshll.u32 (!%p251_p13), %s1067_s10, 5 }
  0x22   : > { %s796_s11 = smul.u32 (!%p251_p13), 40, %s1067_s10  ;;  %s281_s26 = scalar_lea.vmem (!%p251_p13), [#allocation3], %s737_s23 }
  0x23   : > { %s590_s27 = sshll.u32 (!%p251_p13), %s281_s26, 4  ;;  %s1094_s4 = scalar_lea.hbm (!%p251_p13), %s1178_s2, %s763_s28  ;;  %s1088_s27 = int_to_ptr.vmem [resolvable:$true] %s590_s27 }
  0x24   : > { %s259_s21 = scalar_lea.vmem (!%p251_p13), [#allocation2], %s796_s11  ;;  %s571_s5 = scalar_lea.sflag (!%p251_p13), [#allocation4], %s1067_s10 }
  0x25   : > { %s864_s6 = scalar_lea.vmem (!%p251_p13), %s1088_s27, 512  ;;  %s972_s7 = smov (!%p251_p13), [#allocation3]  }
  0x26   : > { %v743_v6 = vld [vmem:[%s1177_s1 + $0x4] sm:$0xf]  ;;  %vm324_vm0 = vcmask 1043456   ;;  %v304_v7 = vld [vmem:[%s1177_s1] sm:$0xf]  ;;  %vm317_vm1 = vcmask 64512   ;;  %p865_p0 = scmp.ne.s32.totalorder %s1088_s27, %s864_s6 }
  0x27   : > { %791 = vmatprep.subr.msk.bf16.mxu0 %vm324_vm0, %v743_v6  ;;  %v326_v8 = vsel %vm324_vm0, %v743_v6, 0  ;;  %792 = vmatprep.subr.msk.bf16.mxu1 %vm324_vm0, %v304_v7  ;;  %v394_v9 = vsel %vm324_vm0, %v304_v7, 0  ;;  %v752_v10 = vld [vmem:[%s1177_s1 + $0x8] sm:$0xf]  ;;  %v859_v11 = vld [vmem:[%s259_s21 + $0x14] sm:$0xff]   ;;  %vm531_vm3 = vcmask 523264  }
  0x28   : > { %774 = vmatpush3.bf16.msra.mxu0 %v326_v8  ;;  %780 = vmatpush3.bf16.msra.mxu1 %v394_v9  ;;  %v860_v12 = vld [vmem:[%s259_s21] sm:$0xff]   ;;  %v476_v14 = vsel %vm324_vm0, %v752_v10, 0  ;;  %v862_v17 = vld [vmem:[%s259_s21 + $0x8] sm:$0xff]   ;;  %v863_v18 = vld [vmem:[%s259_s21 + $0x10] ss:$0 sps:$4 sm:$0x11]   ;;  %p866_p1 = pnand %p865_p0, %p1035_p5 }
  0x29   : > { %793 = vmatprep.subr.msk.bf16.mxu0 %vm324_vm0, %v752_v10  ;;  %775 = vmatprep.mubr.msk.bf16.mxu0 %vm317_vm1, %v859_v11  ;;  %v861_v13 = vld [vmem:[%s259_s21 + $0x1c] sm:$0xff]   ;;  %v451_v15 = vshrl.u32 %v860_v12, 16  ;;  %v453_v16 = vshll.u32 %v860_v12, 16  ;;  %v457_v20 = vshll.u32 %v862_v17, 16  ;;  %v461_v21 = vshrl.u32 %v862_v17, 16  ;;  %s868_s8 = sshll.u32 %s972_s7, 4  ;;  %s869_s8 = int_to_ptr.vmem [resolvable:$false] %s868_s8 }
  0x2a   : > { %781 = vmatprep.mubr.msk.bf16.mxu1 %vm317_vm1, %v860_v12  ;;  %v465_v22 = vshll.u32 %v863_v18, 16  ;;  %vm450_vm2 = vsmask.f32 7424  ;;  %p867_p2 = pneg %p866_p1  ;;  %s870_s9 = scalar_lea.vmem %s869_s8, 1024 }
  0x2b   : > { %776 = vmatmul.mubr.msk.bf16.vlgmr.msra.gmra.mxu0 %vm317_vm1, %v861_v13  ;;  %v455_v19 = vrot.slane %v453_v16, 1  ;;  %782 = vmatmul.mubr.msk.bf16.vlgmr.msra.gmra.mxu1 %vm317_vm1, %v862_v17  ;;  %v459_v24 = vrot.slane %v457_v20, 1  ;;  %p871_p3 = scmp.lt.s32.totalorder %s1088_s27, %s869_s8  ;;  %p872_p4 = scmp.lt.s32.totalorder %s870_s9, %s864_s6 }
  0x2c   : > { %786 = vmatpush3.bf16.msra.mxu0 %v476_v14  ;;  %v467_v25 = vrot.slane %v465_v22, 1 }
  0x2d   : > { %v456_v23 = vor.u32 %v455_v19, %v451_v15  ;;  %v463_v27 = vor.u32 %v461_v21, %v459_v24  ;;  %p873_p6 = por %p872_p4, %p871_p3 }
  0x2f   : > { %v460_v26 = vsel %vm450_vm2, %v456_v23, %v459_v24  ;;  %v468_v28 = vsel %vm450_vm2, %v463_v27, %v467_v25  ;;  %p874_p7 = pnand %p873_p6, %p867_p2 }
  0x30   : > { %787 = vmatprep.mubr.msk.bf16.mxu0 %vm317_vm1, %v460_v26 }
  0x33   : > { %788 = vmatmul.mubr.msk.bf16.vlgmr.msra.gmra.mxu0 %vm317_vm1, %v468_v28 }
  0xeb   : > { %v777_v29 = vpop.f32.mrf.mxu0  ;;  %v783_v30 = vpop.f32.mrf.mxu1 }
  0xec   : > { %v439_v36 = vadd.f32 %v783_v30, %v777_v29 }
  0xed   : > { %v362_v31 = vpop.f32.mrf.mxu0  ;;  %v430_v32 = vpop.f32.mrf.mxu1 }
  0xee   : > { %v431_v38 = vadd.f32 %v430_v32, %v362_v31 }
  0xef   : > { %v778_v33 = vpop.f32.mrf.mxu0  ;;  %v784_v35 = vpop.f32.mrf.mxu1 }
  0xf0   : > { %v442_v42 = vadd.f32 %v784_v35, %v778_v33 }
  0xf1   : > { %v365_v34 = vpop.f32.mrf.mxu0  ;;  %v433_v40 = vpop.f32.mrf.mxu1 }
  0xf2   : > { %v434_v45 = vadd.f32 %v433_v40, %v365_v34 }
  0xf3   : > { %v789_v37 = vpop.f32.mrf.mxu0 }
  0xf4   : > { %v529_v39 = vadd.f32 %v789_v37, %v439_v36 }
  0xf5   : > { %v512_v41 = vpop.f32.mrf.mxu0 }
  0xf6   : > { %534 = vst.msk [vmem:[%s281_s26 + $0x10] sm:$0xff] %vm531_vm3, %v529_v39  ;;  %v527_v43 = vadd.f32 %v512_v41, %v431_v38  ;;  %v551_v50 = vmul.f32 %v529_v39, %v529_v39 }
  0xf7   : > { %v790_v44 = vpop.f32.mrf.mxu0 }
  0xf8   : > { %532 = vst.msk [vmem:[%s281_s26] sm:$0xff] %vm531_vm3, %v527_v43  ;;  %v530_v46 = vadd.f32 %v790_v44, %v442_v42  ;;  %v549_v48 = vmul.f32 %v527_v43, %v527_v43  ;;  %v536_v51 = vsel %vm531_vm3, %v527_v43, 0.0 }
  0xf9   : > { %v515_v47 = vpop.f32.mrf.mxu0 }
  0xfa   : > { %535 = vst.msk [vmem:[%s281_s26 + $0x18] sm:$0xff] %vm531_vm3, %v530_v46  ;;  %v528_v49 = vadd.f32 %v515_v47, %v434_v45 }
  0xfc   : > { %533 = vst.msk [vmem:[%s281_s26 + $0x8] sm:$0xff] %vm531_vm3, %v528_v49  ;;  %v537_v52 = vsel %vm531_vm3, %v528_v49, 0.0  ;;  %v550_v53 = vmul.f32 %v528_v49, %v528_v49 }
  0xfd   : > { %v538_v54 = vadd.f32 %v537_v52, %v536_v51 }
  0xfe   : > { %877 = shalt.err (!%p874_p7)
}
  0xff   : > { %s878_s11 = scalar_lea.hbm %s1094_s4, 512  ;;  %s882_s21 = scalar_lea.hbm %s1178_s2, 1024 }
 0x100   : > { %p879_p8 = scmp.ne.s32.totalorder %s1094_s4, %s878_s11  ;;  %p883_p13 = scmp.lt.s32.totalorder %s1094_s4, %s1178_s2 }
 0x101   : > { %p884_p0 = scmp.lt.s32.totalorder %s882_s21, %s878_s11 }
 0x102   : > { %p880_p11 = pnand %p879_p8, %p1035_p5 }
 0x103   : > { %p885_p1 = por %p884_p0, %p883_p13 }
 0x104   : > { %p881_p12 = pneg %p880_p11 }
 0x106   : > { %p886_p2 = pnand %p885_p1, %p881_p12 }
 0x108   : > { %889 = shalt.err (!%p886_p2)
}
 0x109   : > { %s973_s28 = smov 128   ;;  %s974_s29 = smov 8   ;;  %v539_v55 = vsel %vm531_vm3, %v529_v39, 0.0  ;;  %v553_v56 = vsel %vm531_vm3, %v549_v48, 0.0  ;;  %v552_v57 = vmul.f32 %v530_v46, %v530_v46  ;;  %v554_v58 = vsel %vm531_vm3, %v550_v53, 0.0 }
 0x10a   : > { %797 = dma.vmem_to_hbm [thread:$0]  (%p1035_p5), %s1088_s27, 512, %s1094_s4, %s571_s5, %s973_s28, %s973_s28, %s974_s29   ;;  %v540_v59 = vadd.f32 %v539_v55, %v538_v54  ;;  %v555_v60 = vadd.f32 %v554_v58, %v553_v56  ;;  %v556_v61 = vsel %vm531_vm3, %v551_v50, 0.0  ;;  %v541_v62 = vsel %vm531_vm3, %v530_v46, 0.0 }
 0x10b   : > { %v558_v1 = vsel %vm531_vm3, %v552_v57, 0.0  ;;  %s738_s27 = sshll.u32 %s1067_s10, 1  ;;  %s760_s30 = sshll.u32 %s962_s15, 5  ;;  %vm566_vm4 = vcmask 1040384   ;;  %vm568_vm5 = vcmask 517120  }
 0x10c   : > { %v542_v63 = vadd.f32 %v541_v62, %v540_v59  ;;  %v557_v0 = vadd.f32 %v556_v61, %v555_v60  ;;  %s288_s4 = scalar_lea.vmem [#allocation5], %s738_s27  ;;  %s1134_s8 = scalar_lea.hbm %s1179_s3, %s760_s30 }
 0x10d   : > { %s607_s5 = sshll.u32 %s288_s4, 4  ;;  %s576_s9 = scalar_lea.sflag [#allocation6], %s1067_s10  ;;  %s608_s5 = int_to_ptr.vmem [resolvable:$true] %s607_s5 }
 0x10e   : > { %v543_v2 = vrot.slane %v542_v63, 4  ;;  %v559_v3 = vadd.f32 %v558_v1, %v557_v0  ;;  %s890_s11 = scalar_lea.vmem %s608_s5, 32  ;;  %s975_s15 = smov [#allocation5]  }
 0x10f   : > { %p891_p3 = scmp.ne.s32.totalorder %s608_s5, %s890_s11  ;;  %s894_s18 = sshll.u32 %s975_s15, 4  ;;  %s895_s18 = int_to_ptr.vmem [resolvable:$false] %s894_s18 }
 0x110   : > { %v544_v4 = vadd.f32 %v543_v2, %v542_v63  ;;  %v560_v5 = vrot.slane %v559_v3, 4  ;;  %s896_s19 = scalar_lea.vmem %s895_s18, 64  ;;  %p897_p7 = scmp.lt.s32.totalorder %s608_s5, %s895_s18 }
 0x111   : > { %p892_p4 = pnand %p891_p3, %p1035_p5  ;;  %p898_p8 = scmp.lt.s32.totalorder %s896_s19, %s890_s11 }
 0x112   : > { %v545_v6 = vrot.slane %v544_v4, 2  ;;  %v561_v7 = vadd.f32 %v560_v5, %v559_v3 }
 0x113   : > { %p893_p6 = pneg %p892_p4  ;;  %p899_p11 = por %p898_p8, %p897_p7 }
 0x114   : > { %v546_v8 = vadd.f32 %v545_v6, %v544_v4  ;;  %v562_v9 = vrot.slane %v561_v7, 2 }
 0x115   : > { %p900_p12 = pnand %p899_p11, %p893_p6 }
 0x116   : > { %v547_v10 = vrot.slane %v546_v8, 1  ;;  %v563_v11 = vadd.f32 %v562_v9, %v561_v7 }
 0x118   : > { %v564_v12 = vrot.slane %v563_v11, 1  ;;  %v548_v13 = vadd.f32 %v547_v10, %v546_v8 }
 0x11a   : > { %v565_v14 = vadd.f32 %v564_v12, %v563_v11 }
 0x11c   : > { %v567_v15 = vsel %vm566_vm4, %v548_v13, %v565_v14 }
 0x11d   : > { %569 = vst.msk [vmem:[%s288_s4] sm:$0x3] %vm568_vm5, %v567_v15 }
 0x11e   : > { %903 = shalt.err (!%p900_p12)
}
 0x11f   : > { %s904_s21 = scalar_lea.hbm %s1134_s8, 32  ;;  %s908_s26 = scalar_lea.hbm %s1179_s3, 64 }
 0x120   : > { %p905_p13 = scmp.ne.s32.totalorder %s1134_s8, %s904_s21  ;;  %p909_p2 = scmp.lt.s32.totalorder %s1134_s8, %s1179_s3 }
 0x121   : > { %p910_p3 = scmp.lt.s32.totalorder %s908_s26, %s904_s21 }
 0x122   : > { %p906_p0 = pnand %p905_p13, %p1035_p5 }
 0x123   : > { %p911_p4 = por %p910_p3, %p909_p2 }
 0x124   : > { %p907_p1 = pneg %p906_p0 }
 0x126   : > { %p912_p6 = pnand %p911_p4, %p907_p1 }
 0x128   : > { %915 = shalt.err (!%p912_p6)
}
 0x129   : > { %798 = dma.vmem_to_hbm [thread:$0]  (%p1035_p5), %s608_s5, 32, %s1134_s8, %s576_s9  }
 0x12a PF: > { %s619_s27 = sand.u32 1, %s950_s12   ;;  %p802_p7 = pnand %p734_p10, %p1046_p9 }
 0x12b   : > { %s620_s30 = scalar_lea.sflag [#allocation4], %s619_s27 }
 0x12c   : > { %p803_p8 = pneg %p802_p7 }
 0x12e   : > { %941 = dma.done.wait (%p803_p8), %s620_s30, 512  }
 0x12f   : > { %943 = vsyncadd (%p803_p8), %s620_s30, 4294966784  ;;  %s629_s4 = scalar_lea.sflag [#allocation6], %s619_s27 }
 0x130   : > { %945 = dma.done.wait (%p803_p8), %s629_s4, 32  }
 0x131   : > { %947 = vsyncadd (%p803_p8), %s629_s4, 4294967264  ;;  %s20_s17 = sadd.s32 1, %s970_s17   ;;  %s1182_s12 = smov %s954_s13 }
 0x132   : > { %p17_p11 = scmp.ge.s32.totalorder %s20_s17, 4   ;;  %s1183_s13 = smov %s958_s14 }
 0x133   : > { %s1184_s14 = smov %s1044_s24  ;;  %s1185_s15 = smov %s966_s16 }
 0x134   : > { %s1186_s16 = smov %s1188_s20  ;;  %19 = sbr.rel (!%p17_p11) target bundleno = 6 (0x6), region = 132 }
 0x139   :  { %634 = vsyncpa [#allocation4], 1 }
 0x13a   :  { %636 = vsyncpa [#allocation4 + $0x1], 1 }
 0x13b   :  { %637 = vsyncpa [#allocation6], 1 }
 0x13c   :  { %639 = vsyncpa [#allocation6 + $0x1], 1 }

</bundles_post_ra>
